<compile_context>
chip_gen: v7x
topology: tpu7x:2x2x1
jax: 0.10.0
libtpu: 0.0.40
codegen_flags: <defaults>
</compile_context>

<pallas_src>
import jax
import jax.numpy as jnp
from jax.experimental import pallas as pl
from jax.experimental.pallas import tpu as pltpu

_VMEM_LIMIT_BYTES = 40 * 1024 * 1024
_BN_EPS = 1e-5


# ------------------------------ kernel helpers -------------------------------

def _layer1_vpu(x, w1_ref, b1_ref):
    """Layer 1: K = Cin is tiny (e.g. 4) -> VPU broadcast-FMAs, not the MXU."""
    w1 = w1_ref[...]                               # (C1, Cin) f32
    cin = x.shape[0]
    acc = w1[:, 0:1] * x[0:1, :]
    for c in range(1, cin):
        acc = acc + w1[:, c:c + 1] * x[c:c + 1, :]
    return jnp.maximum(acc + b1_ref[...], 0.0)


def _conv_bn_relu(w_ref, b_ref, h_f32):
    """Conv1d(k=1)+folded BN+ReLU: bf16 MXU matmul, f32 accumulate/epilogue."""
    y = jnp.dot(w_ref[...], h_f32.astype(jnp.bfloat16),
                preferred_element_type=jnp.float32)
    return jnp.maximum(y + b_ref[...], 0.0)


# ------------------------------ kernels ---------------------------------------

def _stage1_kernel(x_ref, w1, b1, w2, b2, w3, b3, w4, b4, pooled_out):
    """Per-point MLP1 + running max pool (into the resident output block)."""
    t = pl.program_id(2)
    x = x_ref[0]                                   # (Cin, NT) f32

    h1 = _layer1_vpu(x, w1, b1)
    h2 = _conv_bn_relu(w2, b2, h1)
    h3 = _conv_bn_relu(w3, b3, h2)
    h4 = _conv_bn_relu(w4, b4, h3)

    tile_max = jnp.max(h4, axis=-1, keepdims=True)  # (C4, 1)

    @pl.when(t == 0)
    def _():
        pooled_out[0, 0] = tile_max

    @pl.when(t > 0)
    def _():
        pooled_out[0, 0] = jnp.maximum(pooled_out[0, 0], tile_max)


def _stage2_kernel(x_ref, col5_ref, w1, b1, w2, b2, w5a, w6, b6, wfc, bfc,
                   out_ref):
    """Recompute h2 from x, then per-point MLP2 + final fc (no cross-tile state)."""
    x = x_ref[0]                                   # (Cin, NT) f32
    h1 = _layer1_vpu(x, w1, b1)
    h2 = _conv_bn_relu(w2, b2, h1)                 # second_layer_out (recomputed)

    col5 = col5_ref[0]                             # (C5, 1) = w5b @ pooled + b5
    h5 = jnp.maximum(
        jnp.dot(w5a[...], h2.astype(jnp.bfloat16),
                preferred_element_type=jnp.float32) + col5, 0.0)
    h6 = _conv_bn_relu(w6, b6, h5)
    out = jnp.dot(wfc[...], h6.astype(jnp.bfloat16),
                  preferred_element_type=jnp.float32) + bfc[...]
    out_ref[0] = out.astype(out_ref.dtype)


# ------------------------------ wrapper ---------------------------------------

def _pick_n_tile(n, max_tile=4096):
    assert n % 128 == 0, "number of points must be a multiple of 128"
    best, t = 128, 128
    while t <= min(n, max_tile):
        if n % t == 0:
            best = t
        t += 128
    return best


def seg_pointnet_forward(x, p, output_size, n_tile=None):
    """x: (B, Cin, N) f32; p: dict from init_params; returns (B, output_size, N)."""
    B, Cin, N = x.shape
    if n_tile is None:
        n_tile = _pick_n_tile(N)
    assert N % n_tile == 0 and n_tile % 128 == 0
    T = N // n_tile
    S = 2 if (T >= 2 and T % 2 == 0) else 1        # core-split of the pooled reduction
    Ti = T // S

    C2 = p['w2'].shape[0]
    C4 = p['w4'].shape[0]
    C5 = p['w5a'].shape[0]

    wmap1 = lambda b, s, t: (0, 0)
    wmap2 = lambda b, t: (0, 0)

    # ---- stage 1: per-point MLP1 + partial pooled max columns (no h2 staging)
    stage1_weights = (p['w1'], p['b1'], p['w2'], p['b2'],
                      p['w3'], p['b3'], p['w4'], p['b4'])
    pooled = pl.pallas_call(
        _stage1_kernel,
        out_shape=jax.ShapeDtypeStruct((B, S, C4, 1), jnp.float32),
        grid_spec=pltpu.PrefetchScalarGridSpec(
            num_scalar_prefetch=0,
            grid=(B, S, Ti),
            in_specs=[pl.BlockSpec((1, Cin, n_tile),
                                   lambda b, s, t: (b, 0, s * Ti + t))]
                     + [pl.BlockSpec(w.shape, wmap1) for w in stage1_weights],
            out_specs=pl.BlockSpec((1, 1, C4, 1), lambda b, s, t: (b, s, 0, 0))),
        compiler_params=pltpu.CompilerParams(
            dimension_semantics=("parallel", "parallel", "arbitrary"),
            vmem_limit_bytes=_VMEM_LIMIT_BYTES),
    )(x, *stage1_weights)

    # Combine the S partial max columns, then fold the pooled term into the
    # layer-5 "bias" column: col5 = w5b @ pooled + b5 (tiny per-batch matvec).
    pooled_full = jnp.max(pooled, axis=1)          # (B, C4, 1)
    col5 = jnp.einsum('oc,bcx->box', p['w5b'], pooled_full,
                      precision=jax.lax.Precision.HIGHEST) + p['b5'][None]

    # ---- stage 2: recompute h2 from x, per-point MLP2 + final fc (fully parallel)
    out = pl.pallas_call(
        _stage2_kernel,
        out_shape=jax.ShapeDtypeStruct((B, output_size, N), jnp.float32),
        grid_spec=pltpu.PrefetchScalarGridSpec(
            num_scalar_prefetch=0,
            grid=(B, T),
            in_specs=[pl.BlockSpec((1, Cin, n_tile), lambda b, t: (b, 0, t)),
                      pl.BlockSpec((1, C5, 1), lambda b, t: (b, 0, 0)),
                      pl.BlockSpec(p['w1'].shape, wmap2),
                      pl.BlockSpec(p['b1'].shape, wmap2),
                      pl.BlockSpec(p['w2'].shape, wmap2),
                      pl.BlockSpec(p['b2'].shape, wmap2),
                      pl.BlockSpec(p['w5a'].shape, wmap2),
                      pl.BlockSpec(p['w6'].shape, wmap2),
                      pl.BlockSpec(p['b6'].shape, wmap2),
                      pl.BlockSpec(p['wfc'].shape, wmap2),
                      pl.BlockSpec(p['bfc'].shape, wmap2)],
            out_specs=pl.BlockSpec((1, output_size, n_tile),
                                   lambda b, t: (b, 0, t))),
        compiler_params=pltpu.CompilerParams(
            dimension_semantics=("parallel", "parallel"),
            vmem_limit_bytes=_VMEM_LIMIT_BYTES),
    )(x, col5, p['w1'], p['b1'], p['w2'], p['b2'],
      p['w5a'], p['w6'], p['b6'], p['wfc'], p['bfc'])
    return out


# --------------------- deterministic parameter construction -------------------

def _make_conv_bn(key, in_c, out_c):
    """Conv1d(in_c,out_c,1) + BatchNorm1d(out_c) in eval mode, folded."""
    k1, k2, k3, k4, k5, k6 = jax.random.split(key, 6)
    w = jax.random.normal(k1, (out_c, in_c), jnp.float32) / jnp.sqrt(float(in_c))
    b = 0.05 * jax.random.normal(k2, (out_c,), jnp.float32)
    gamma = 1.0 + 0.1 * jax.random.normal(k3, (out_c,), jnp.float32)
    beta = 0.1 * jax.random.normal(k4, (out_c,), jnp.float32)
    mean = 0.1 * jax.random.normal(k5, (out_c,), jnp.float32)
    var = 1.0 + 0.1 * jnp.abs(jax.random.normal(k6, (out_c,), jnp.float32))
    s = gamma / jnp.sqrt(var + _BN_EPS)
    return w * s[:, None], ((b - mean) * s + beta).reshape(out_c, 1)


def _make_fc(key, in_c, out_c):
    k1, k2 = jax.random.split(key)
    w = jax.random.normal(k1, (out_c, in_c), jnp.float32) / jnp.sqrt(float(in_c))
    b = 0.05 * jax.random.normal(k2, (out_c,), jnp.float32)
    return w, b.reshape(out_c, 1)


def init_params(key, input_channel, per_point_mlp1, per_point_mlp2, output_size):
    assert len(per_point_mlp1) == 4 and len(per_point_mlp2) == 2, \
        "kernel is specialized to the 4 + 2 + fc SegPointNet layout"
    keys = jax.random.split(key, len(per_point_mlp1) + len(per_point_mlp2) + 1)
    raw, in_c, ki = [], input_channel, 0
    for out_c in per_point_mlp1:
        raw.append(_make_conv_bn(keys[ki], in_c, out_c)); ki += 1; in_c = out_c
    c2 = per_point_mlp1[1]
    in_c = in_c + c2                       # concat([second_layer_out, pooled])
    for out_c in per_point_mlp2:
        raw.append(_make_conv_bn(keys[ki], in_c, out_c)); ki += 1; in_c = out_c
    raw.append(_make_fc(keys[ki], in_c, output_size))

    (w1, b1), (w2, b2), (w3, b3), (w4, b4), (w5, b5), (w6, b6), (wfc, bfc) = raw
    bf16 = jnp.bfloat16
    return dict(
        w1=w1, b1=b1,                      # layer 1 stays f32 (VPU path)
        w2=w2.astype(bf16), b2=b2,
        w3=w3.astype(bf16), b3=b3,
        w4=w4.astype(bf16), b4=b4,
        w5a=w5[:, :c2].astype(bf16),       # acts on h2 (second_layer_out)
        w5b=w5[:, c2:],                    # acts on pooled; tiny, kept f32
        b5=b5,
        w6=w6.astype(bf16), b6=b6,
        wfc=wfc.astype(bf16), bfc=bfc,
    )


# ---------------- pure-JAX reference (mirrors the bf16 quantization) ----------

def ref_forward(x, p):
    f32 = jnp.float32
    hi = jax.lax.Precision.HIGHEST
    q = lambda a: a.astype(jnp.bfloat16).astype(f32)

    h1 = jnp.maximum(
        jnp.einsum('oc,bcn->bon', p['w1'], x, precision=hi) + p['b1'][None], 0.0)

    def layer(w, b, h):
        y = jnp.einsum('oc,bcn->bon', w.astype(f32), q(h), precision=hi)
        return jnp.maximum(y + b[None], 0.0)

    h2 = layer(p['w2'], p['b2'], h1)
    h3 = layer(p['w3'], p['b3'], h2)
    h4 = layer(p['w4'], p['b4'], h3)
    pooled = jnp.max(h4, axis=-1, keepdims=True)
    col5 = jnp.einsum('oc,bcx->box', p['w5b'], pooled, precision=hi) + p['b5'][None]
    h5 = jnp.maximum(
        jnp.einsum('oc,bcn->bon', p['w5a'].astype(f32), q(h2), precision=hi)
        + col5, 0.0)
    h6 = layer(p['w6'], p['b6'], h5)
    return (jnp.einsum('oc,bcn->bon', p['wfc'].astype(f32), q(h6), precision=hi)
            + p['bfc'][None])


if __name__ == "__main__":
    B, Cin, N = 2, 4, 512
    per_point_mlp1 = [32, 64, 64, 128]
    per_point_mlp2 = [128, 64]
    output_size = 8

    key = jax.random.PRNGKey(0)
    kx, kp = jax.random.split(key)
    x = jax.random.normal(kx, (B, Cin, N), jnp.float32)
    params = init_params(kp, Cin, per_point_mlp1, per_point_mlp2, output_size)

    # n_tile=128 so the test exercises both the multi-tile pooled-max
    # accumulation (t > 0 path) and the S=2 partial-max core split.
    out = seg_pointnet_forward(x, params, output_size, n_tile=128)
    out = jax.block_until_ready(out)

    ref = jax.block_until_ready(ref_forward(x, params))
    assert out.shape == (B, output_size, N), out.shape
    err = float(jnp.max(jnp.abs(out - ref)))
    assert err < 1e-2, err

    print("KERNEL_OK")
</pallas_src>

<mosaic_0001>
module attributes {stable_mosaic.version = 11 : i64} {
  func.func @_stage1_kernel(%arg0: i32, %arg1: i32, %arg2: i32, %arg3: memref<1x4x128xf32, #tpu.memory_space<vmem>>, %arg4: memref<32x4xf32, #tpu.memory_space<vmem>>, %arg5: memref<32x1xf32, #tpu.memory_space<vmem>>, %arg6: memref<64x32xbf16, #tpu.memory_space<vmem>>, %arg7: memref<64x1xf32, #tpu.memory_space<vmem>>, %arg8: memref<64x64xbf16, #tpu.memory_space<vmem>>, %arg9: memref<64x1xf32, #tpu.memory_space<vmem>>, %arg10: memref<128x64xbf16, #tpu.memory_space<vmem>>, %arg11: memref<128x1xf32, #tpu.memory_space<vmem>>, %arg12: memref<1x1x128x1xf32, #tpu.memory_space<vmem>>) attributes {dimension_semantics = [#tpu.dimension_semantics<parallel>, #tpu.dimension_semantics<parallel>, #tpu.dimension_semantics<arbitrary>], iteration_bounds = array<i64: 2, 2, 2>, scalar_prefetch = 0 : i64, scratch_operands = 0 : i64, tpu.core_type = #tpu.core_type<tc>, window_params = [{transform_indices = @transform_0, window_bounds = array<i64: 1, 4, 128>}, {pipeline_mode = #tpu.pipeline_mode<synchronous>, transform_indices = @transform_1, window_bounds = array<i64: 32, 4>}, {pipeline_mode = #tpu.pipeline_mode<synchronous>, transform_indices = @transform_2, window_bounds = array<i64: 32, 1>}, {pipeline_mode = #tpu.pipeline_mode<synchronous>, transform_indices = @transform_3, window_bounds = array<i64: 64, 32>}, {pipeline_mode = #tpu.pipeline_mode<synchronous>, transform_indices = @transform_4, window_bounds = array<i64: 64, 1>}, {pipeline_mode = #tpu.pipeline_mode<synchronous>, transform_indices = @transform_5, window_bounds = array<i64: 64, 64>}, {pipeline_mode = #tpu.pipeline_mode<synchronous>, transform_indices = @transform_6, window_bounds = array<i64: 64, 1>}, {pipeline_mode = #tpu.pipeline_mode<synchronous>, transform_indices = @transform_7, window_bounds = array<i64: 128, 64>}, {pipeline_mode = #tpu.pipeline_mode<synchronous>, transform_indices = @transform_8, window_bounds = array<i64: 128, 1>}, {transform_indices = @transform_9, window_bounds = array<i64: 1, 1, 128, 1>}]} {
    %c0 = arith.constant 0 : index
    %c0_0 = arith.constant 0 : index
    %c0_1 = arith.constant 0 : index
    %0 = vector.load %arg3[%c0, %c0_0, %c0_1] : memref<1x4x128xf32, #tpu.memory_space<vmem>>, vector<1x4x128xf32>
    %1 = vector.shape_cast %0 : vector<1x4x128xf32> to vector<4x128xf32>
    %c0_2 = arith.constant 0 : index
    %c0_3 = arith.constant 0 : index
    %2 = vector.load %arg4[%c0_2, %c0_3] : memref<32x4xf32, #tpu.memory_space<vmem>>, vector<32x4xf32>
    %3 = vector.extract_strided_slice %2 {offsets = [0, 0], sizes = [32, 1], strides = [1, 1]} : vector<32x4xf32> to vector<32x1xf32>
    %4 = vector.extract_strided_slice %1 {offsets = [0, 0], sizes = [1, 128], strides = [1, 1]} : vector<4x128xf32> to vector<1x128xf32>
    %5 = vector.broadcast %3 : vector<32x1xf32> to vector<32x128xf32>
    %6 = vector.broadcast %4 : vector<1x128xf32> to vector<32x128xf32>
    %7 = arith.mulf %5, %6 : vector<32x128xf32>
    %8 = vector.extract_strided_slice %2 {offsets = [0, 1], sizes = [32, 1], strides = [1, 1]} : vector<32x4xf32> to vector<32x1xf32>
    %9 = vector.extract_strided_slice %1 {offsets = [1, 0], sizes = [1, 128], strides = [1, 1]} : vector<4x128xf32> to vector<1x128xf32>
    %10 = vector.broadcast %8 : vector<32x1xf32> to vector<32x128xf32>
    %11 = vector.broadcast %9 : vector<1x128xf32> to vector<32x128xf32>
    %12 = arith.mulf %10, %11 : vector<32x128xf32>
    %13 = arith.addf %7, %12 : vector<32x128xf32>
    %14 = vector.extract_strided_slice %2 {offsets = [0, 2], sizes = [32, 1], strides = [1, 1]} : vector<32x4xf32> to vector<32x1xf32>
    %15 = vector.extract_strided_slice %1 {offsets = [2, 0], sizes = [1, 128], strides = [1, 1]} : vector<4x128xf32> to vector<1x128xf32>
    %16 = vector.broadcast %14 : vector<32x1xf32> to vector<32x128xf32>
    %17 = vector.broadcast %15 : vector<1x128xf32> to vector<32x128xf32>
    %18 = arith.mulf %16, %17 : vector<32x128xf32>
    %19 = arith.addf %13, %18 : vector<32x128xf32>
    %20 = vector.extract_strided_slice %2 {offsets = [0, 3], sizes = [32, 1], strides = [1, 1]} : vector<32x4xf32> to vector<32x1xf32>
    %21 = vector.extract_strided_slice %1 {offsets = [3, 0], sizes = [1, 128], strides = [1, 1]} : vector<4x128xf32> to vector<1x128xf32>
    %22 = vector.broadcast %20 : vector<32x1xf32> to vector<32x128xf32>
    %23 = vector.broadcast %21 : vector<1x128xf32> to vector<32x128xf32>
    %24 = arith.mulf %22, %23 : vector<32x128xf32>
    %25 = arith.addf %19, %24 : vector<32x128xf32>
    %c0_4 = arith.constant 0 : index
    %c0_5 = arith.constant 0 : index
    %26 = vector.load %arg5[%c0_4, %c0_5] : memref<32x1xf32, #tpu.memory_space<vmem>>, vector<32x1xf32>
    %27 = vector.broadcast %26 : vector<32x1xf32> to vector<32x128xf32>
    %28 = arith.addf %25, %27 : vector<32x128xf32>
    %cst = arith.constant 0.000000e+00 : f32
    %29 = vector.broadcast %cst : f32 to vector<32x128xf32>
    %30 = arith.maximumf %28, %29 : vector<32x128xf32>
    %c0_6 = arith.constant 0 : index
    %c0_7 = arith.constant 0 : index
    %31 = vector.load %arg6[%c0_6, %c0_7] : memref<64x32xbf16, #tpu.memory_space<vmem>>, vector<64x32xbf16>
    %32 = arith.truncf %30 : vector<32x128xf32> to vector<32x128xbf16>
    %cst_8 = arith.constant dense<0.000000e+00> : vector<64x128xf32>
    %33 = tpu.matmul %31, %32, %cst_8 {dimension_numbers = #tpu.dot_dimension_numbers<[1], [0], [0], [1], [0, 0, 1, 1], [], []>} : vector<64x32xbf16>, vector<32x128xbf16>, vector<64x128xf32> -> vector<64x128xf32>
    %c0_9 = arith.constant 0 : index
    %c0_10 = arith.constant 0 : index
    %34 = vector.load %arg7[%c0_9, %c0_10] : memref<64x1xf32, #tpu.memory_space<vmem>>, vector<64x1xf32>
    %35 = vector.broadcast %34 : vector<64x1xf32> to vector<64x128xf32>
    %36 = arith.addf %33, %35 : vector<64x128xf32>
    %cst_11 = arith.constant 0.000000e+00 : f32
    %37 = vector.broadcast %cst_11 : f32 to vector<64x128xf32>
    %38 = arith.maximumf %36, %37 : vector<64x128xf32>
    %c0_12 = arith.constant 0 : index
    %c0_13 = arith.constant 0 : index
    %39 = vector.load %arg8[%c0_12, %c0_13] : memref<64x64xbf16, #tpu.memory_space<vmem>>, vector<64x64xbf16>
    %40 = arith.truncf %38 : vector<64x128xf32> to vector<64x128xbf16>
    %cst_14 = arith.constant dense<0.000000e+00> : vector<64x128xf32>
    %41 = tpu.matmul %39, %40, %cst_14 {dimension_numbers = #tpu.dot_dimension_numbers<[1], [0], [0], [1], [0, 0, 1, 1], [], []>} : vector<64x64xbf16>, vector<64x128xbf16>, vector<64x128xf32> -> vector<64x128xf32>
    %c0_15 = arith.constant 0 : index
    %c0_16 = arith.constant 0 : index
    %42 = vector.load %arg9[%c0_15, %c0_16] : memref<64x1xf32, #tpu.memory_space<vmem>>, vector<64x1xf32>
    %43 = vector.broadcast %42 : vector<64x1xf32> to vector<64x128xf32>
    %44 = arith.addf %41, %43 : vector<64x128xf32>
    %cst_17 = arith.constant 0.000000e+00 : f32
    %45 = vector.broadcast %cst_17 : f32 to vector<64x128xf32>
    %46 = arith.maximumf %44, %45 : vector<64x128xf32>
    %c0_18 = arith.constant 0 : index
    %c0_19 = arith.constant 0 : index
    %47 = vector.load %arg10[%c0_18, %c0_19] : memref<128x64xbf16, #tpu.memory_space<vmem>>, vector<128x64xbf16>
    %48 = arith.truncf %46 : vector<64x128xf32> to vector<64x128xbf16>
    %cst_20 = arith.constant dense<0.000000e+00> : vector<128x128xf32>
    %49 = tpu.matmul %47, %48, %cst_20 {dimension_numbers = #tpu.dot_dimension_numbers<[1], [0], [0], [1], [0, 0, 1, 1], [], []>} : vector<128x64xbf16>, vector<64x128xbf16>, vector<128x128xf32> -> vector<128x128xf32>
    %c0_21 = arith.constant 0 : index
    %c0_22 = arith.constant 0 : index
    %50 = vector.load %arg11[%c0_21, %c0_22] : memref<128x1xf32, #tpu.memory_space<vmem>>, vector<128x1xf32>
    %51 = vector.broadcast %50 : vector<128x1xf32> to vector<128x128xf32>
    %52 = arith.addf %49, %51 : vector<128x128xf32>
    %cst_23 = arith.constant 0.000000e+00 : f32
    %53 = vector.broadcast %cst_23 : f32 to vector<128x128xf32>
    %54 = arith.maximumf %52, %53 : vector<128x128xf32>
    %cst_24 = arith.constant dense<0xFF800000> : vector<128xf32>
    %55 = vector.multi_reduction <maximumf>, %54, %cst_24 [1] : vector<128x128xf32> to vector<128xf32>
    %56 = vector.shape_cast %55 : vector<128xf32> to vector<128x1xf32>
    %c0_i32 = arith.constant 0 : i32
    %57 = arith.cmpi eq, %arg2, %c0_i32 : i32
    %58 = arith.extui %57 : i1 to i32
    %c0_i32_25 = arith.constant 0 : i32
    %59 = arith.cmpi ne, %58, %c0_i32_25 : i32
    scf.if %59 {
      %c0_28 = arith.constant 0 : index
      %c0_29 = arith.constant 0 : index
      %c0_30 = arith.constant 0 : index
      %c0_31 = arith.constant 0 : index
      %63 = vector.load %arg12[%c0_28, %c0_29, %c0_30, %c0_31] : memref<1x1x128x1xf32, #tpu.memory_space<vmem>>, vector<1x1x128x1xf32>
      %64 = vector.shape_cast %63 : vector<1x1x128x1xf32> to vector<128x1xf32>
      %65 = vector.shape_cast %56 : vector<128x1xf32> to vector<1x1x128x1xf32>
      tpu.vector_store %arg12[%c0_28, %c0_29, %c0_30, %c0_31], %65 {strides = array<i32>} : memref<1x1x128x1xf32, #tpu.memory_space<vmem>>, vector<1x1x128x1xf32>,
    } else {
    }
    %c0_i32_26 = arith.constant 0 : i32
    %60 = arith.cmpi sgt, %arg2, %c0_i32_26 : i32
    %61 = arith.extui %60 : i1 to i32
    %c0_i32_27 = arith.constant 0 : i32
    %62 = arith.cmpi ne, %61, %c0_i32_27 : i32
    scf.if %62 {
      %c0_28 = arith.constant 0 : index
      %c0_29 = arith.constant 0 : index
      %c0_30 = arith.constant 0 : index
      %c0_31 = arith.constant 0 : index
      %63 = vector.load %arg12[%c0_28, %c0_29, %c0_30, %c0_31] : memref<1x1x128x1xf32, #tpu.memory_space<vmem>>, vector<1x1x128x1xf32>
      %64 = vector.shape_cast %63 : vector<1x1x128x1xf32> to vector<128x1xf32>
      %65 = arith.maximumf %64, %56 : vector<128x1xf32>
      %c0_32 = arith.constant 0 : index
      %c0_33 = arith.constant 0 : index
      %c0_34 = arith.constant 0 : index
      %c0_35 = arith.constant 0 : index
      %66 = vector.load %arg12[%c0_32, %c0_33, %c0_34, %c0_35] : memref<1x1x128x1xf32, #tpu.memory_space<vmem>>, vector<1x1x128x1xf32>
      %67 = vector.shape_cast %66 : vector<1x1x128x1xf32> to vector<128x1xf32>
      %68 = vector.shape_cast %65 : vector<128x1xf32> to vector<1x1x128x1xf32>
      tpu.vector_store %arg12[%c0_32, %c0_33, %c0_34, %c0_35], %68 {strides = array<i32>} : memref<1x1x128x1xf32, #tpu.memory_space<vmem>>, vector<1x1x128x1xf32>,
    } else {
    }
    return
  }
  func.func @transform_0(%arg0: i32, %arg1: i32, %arg2: i32) -> (i32, i32, i32) {
    %c2_i32 = arith.constant 2 : i32
    %0 = arith.muli %arg1, %c2_i32 : i32
    %1 = arith.addi %0, %arg2 : i32
    %c0_i32 = arith.constant 0 : i32
    %c0_i32_0 = arith.constant 0 : i32
    return %arg0, %c0_i32, %1 : i32, i32, i32
  }
  func.func @transform_1(%arg0: i32, %arg1: i32, %arg2: i32) -> (i32, i32) {
    %c0_i32 = arith.constant 0 : i32
    %c0_i32_0 = arith.constant 0 : i32
    %c0_i32_1 = arith.constant 0 : i32
    return %c0_i32, %c0_i32_0 : i32, i32
  }
  func.func @transform_2(%arg0: i32, %arg1: i32, %arg2: i32) -> (i32, i32) {
    %c0_i32 = arith.constant 0 : i32
    %c0_i32_0 = arith.constant 0 : i32
    %c0_i32_1 = arith.constant 0 : i32
    return %c0_i32, %c0_i32_0 : i32, i32
  }
  func.func @transform_3(%arg0: i32, %arg1: i32, %arg2: i32) -> (i32, i32) {
    %c0_i32 = arith.constant 0 : i32
    %c0_i32_0 = arith.constant 0 : i32
    %c0_i32_1 = arith.constant 0 : i32
    return %c0_i32, %c0_i32_0 : i32, i32
  }
  func.func @transform_4(%arg0: i32, %arg1: i32, %arg2: i32) -> (i32, i32) {
    %c0_i32 = arith.constant 0 : i32
    %c0_i32_0 = arith.constant 0 : i32
    %c0_i32_1 = arith.constant 0 : i32
    return %c0_i32, %c0_i32_0 : i32, i32
  }
  func.func @transform_5(%arg0: i32, %arg1: i32, %arg2: i32) -> (i32, i32) {
    %c0_i32 = arith.constant 0 : i32
    %c0_i32_0 = arith.constant 0 : i32
    %c0_i32_1 = arith.constant 0 : i32
    return %c0_i32, %c0_i32_0 : i32, i32
  }
  func.func @transform_6(%arg0: i32, %arg1: i32, %arg2: i32) -> (i32, i32) {
    %c0_i32 = arith.constant 0 : i32
    %c0_i32_0 = arith.constant 0 : i32
    %c0_i32_1 = arith.constant 0 : i32
    return %c0_i32, %c0_i32_0 : i32, i32
  }
  func.func @transform_7(%arg0: i32, %arg1: i32, %arg2: i32) -> (i32, i32) {
    %c0_i32 = arith.constant 0 : i32
    %c0_i32_0 = arith.constant 0 : i32
    %c0_i32_1 = arith.constant 0 : i32
    return %c0_i32, %c0_i32_0 : i32, i32
  }
  func.func @transform_8(%arg0: i32, %arg1: i32, %arg2: i32) -> (i32, i32) {
    %c0_i32 = arith.constant 0 : i32
    %c0_i32_0 = arith.constant 0 : i32
    %c0_i32_1 = arith.constant 0 : i32
    return %c0_i32, %c0_i32_0 : i32, i32
  }
  func.func @transform_9(%arg0: i32, %arg1: i32, %arg2: i32) -> (i32, i32, i32, i32) {
    %c0_i32 = arith.constant 0 : i32
    %c0_i32_0 = arith.constant 0 : i32
    %c0_i32_1 = arith.constant 0 : i32
    return %arg0, %arg1, %c0_i32, %c0_i32_0 : i32, i32, i32, i32
  }
}

</mosaic_0001>

<bundles_post_ra>
// kernel: tpu_custom_call.1
= control target key start
LH: loop header
LB: loop body
LE: loop exit
PB: predicated region body
PF: predicated region fallthrough
CT: control target
= control target key end

     0   :  { %s1688_s30 = smov 0   ;;  %s1690_s10 = smov 0   ;;  %s2081_s0 = inlined_call_operand.vmem [shape: f32[2,4,512], index: 0, kind: input, shape index: {}]   ;;  %s2082_s1 = inlined_call_operand.vmem [shape: f32[32,4], index: 1, kind: input, shape index: {}]   ;;  %s2083_s2 = inlined_call_operand.vmem [shape: f32[32,1], index: 2, kind: input, shape index: {}]   ;;  %s2084_s3 = inlined_call_operand.vmem [shape: bf16[64,32], index: 3, kind: input, shape index: {}]   ;;  %s2085_s4 = inlined_call_operand.vmem [shape: f32[64,1], index: 4, kind: input, shape index: {}]   ;;  %s2086_s5 = inlined_call_operand.vmem [shape: bf16[64,64], index: 5, kind: input, shape index: {}]   ;;  %s2087_s6 = inlined_call_operand.vmem [shape: f32[64,1], index: 6, kind: input, shape index: {}]   ;;  %s2088_s7 = inlined_call_operand.vmem [shape: bf16[128,64], index: 7, kind: input, shape index: {}]   ;;  %s2089_s8 = inlined_call_operand.vmem [shape: f32[128,1], index: 8, kind: input, shape index: {}]   ;;  %s2090_s9 = inlined_call_operand.vmem [shape: f32[2,2,128,1], index: 9, kind: output, shape index: {}]  }
   0x1   :  { %s1692_s11 = smov 0   ;;  %s1694_s12 = smov 0  }
   0x2   :  { %s1696_s13 = smov 0   ;;  %s1698_s14 = smov 0  }
   0x3   :  { %s1700_s15 = smov 0  }
   0x4 LB: > { %s31_s16 = sadd.s32 1, %s1620_s12  ;;  %s34_s17 = sadd.s32 1, %s1624_s13  ;;  %s1632_s15 = sphi %s1700_s15, %s19_s15   ;;  %s1628_s14 = sphi %s1698_s14, %s2098_s14   ;;  %s1624_s13 = sphi %s1696_s13, %s2097_s13   ;;  %s1620_s12 = sphi %s1694_s12, %s2096_s12   ;;  %s1616_s11 = sphi %s1692_s11, %s2095_s11   ;;  %s1612_s10 = sphi %s1690_s10, %s2094_s10   ;;  %s1608_s30 = sphi %s1688_s30, %s2093_s30  }
   0x5   : > { %p32_p0 = scmp.ge.s32.totalorder %s31_s16, 2  ;;  %p1370_p1 = scmp.ge.s32.totalorder %s1632_s15, 1 }
   0x6   : > { %p321_p2 = scmp.lt.s32.totalorder %s1632_s15, 9  ;;  %s38_s18 = sadd.s32 1, %s1628_s14 }
   0x7   : > { %s2100_s16 = smov (%p32_p0, %s31_s16), 0  ;;  %s2102_s17 = smov (!%p32_p0, %s34_s17), %s1624_s13 }
   0x8   : > { %p322_p3 = pnand %p1370_p1, %p321_p2  ;;  %p36_p4 = scmp.ge.s32.totalorder %s2102_s17, 2 }
   0x9   : > { %v389_v0 = vld [vmem:[%s2082_s1] sm:$0xff] (!%p322_p3)  ;;  %v1634_v1 = vmov (!%p322_p3), 3   ;;  %v1635_v2 = vmov (!%p322_p3), 1   ;;  %p368_p6 = scmp.lt.s32.totalorder (!%p322_p3), %s1616_s11, 1  ;;  %v390_v3 = vld [vmem:[%s2082_s1 + $0x8] sm:$0xff] (!%p322_p3)  ;;  %p380_p7 = scmp.lt.s32.totalorder (!%p322_p3), %s1612_s10, 1  ;;  %v413_v52 = vlaneseq (!%p322_p3) }
   0xa   : > { %s2104_s17 = smov (%p36_p4, %s2102_s17), 0  ;;  %s2106_s18 = smov (!%p36_p4, %s38_s18), %s1628_s14 }
   0xb   : > { %p40_p5 = scmp.ge.s32.totalorder %s2106_s18, 2  ;;  %325 = sbr.rel (%p322_p3) target bundleno = 1077 (0x435), region = 56  ;;  %1555 = vset.pattern.permute.xlu0 (!%p322_p3), %v1634_v1  ;;  %1551 = vset.pattern.permute.xlu1 (!%p322_p3), %v1635_v2  ;;  %v1636_v4 = vmov (!%p322_p3), 2   ;;  %v392_v5 = vld [vmem:[%s2082_s1 + $0x18] sm:$0xff] (!%p322_p3)  ;;  %v391_v6 = vld [vmem:[%s2082_s1 + $0x10] sm:$0xff] (!%p322_p3)  ;;  %v1637_v7 = vmov (!%p322_p3), 0  }
   0xc   : > { %478 = vperm.xlu0 (!%p322_p3), %1555, %v389_v0   ;;  %422 = vperm.xlu1 (!%p322_p3), %1551, %v389_v0   ;;  %v505_v8 = vld [vmem:[%s2083_s2] sm:$0xff] (!%p322_p3)  ;;  %v508_v9 = vld [vmem:[%s2083_s2 + $0x18] sm:$0xff] (!%p322_p3)  ;;  %v548_v10 = vld [vmem:[%s2085_s4 + $0x8] sm:$0xff] (!%p322_p3)  ;;  %vm615_vm0 = vcmask (!%p322_p3), 261120   ;;  %s1371_s19 = sshll.u32 (!%p322_p3), %s1612_s10, 1  ;;  %v414_v55 = vshrl.u32 (!%p322_p3), %v413_v52, 7 }
   0xd   : > { %s2108_s18 = smov (%p40_p5, %s2106_s18), 0  ;;  %v550_v11 = vld [vmem:[%s2085_s4 + $0x18] sm:$0xff] (!%p322_p3)  ;;  %v552_v12 = vld [vmem:[%s2085_s4 + $0x28] sm:$0xff] (!%p322_p3)  ;;  %v507_v16 = vld [vmem:[%s2083_s2 + $0x10] sm:$0xff] (!%p322_p3)  ;;  %s367_s20 = sadd.s32 (!%p322_p3), %s1608_s30, %s1371_s19  ;;  %vm781_vm1 = vcmask (!%p322_p3), 523264  }
   0xe   : > { %2091 = sst [smem:[#allocation2_spill]] %s2108_s18  ;;  %v554_v13 = vld [vmem:[%s2085_s4 + $0x38] sm:$0xff] (!%p322_p3)  ;;  %v506_v14 = vld [vmem:[%s2083_s2 + $0x8] sm:$0xff] (!%p322_p3)  ;;  %v547_v18 = vld [vmem:[%s2085_s4] sm:$0xff] (!%p322_p3)  ;;  %p370_p8 = scmp.lt.s32.totalorder (!%p322_p3), %s367_s20, 3  ;;  %v415_v57 = vsub.s32 (!%p322_p3), 0, %v414_v55 }
   0xf   : > { %v714_v15 = vld [vmem:[%s2087_s6 + $0x8] sm:$0xff] (!%p322_p3)  ;;  %v716_v17 = vld [vmem:[%s2087_s6 + $0x18] sm:$0xff] (!%p322_p3)  ;;  %v549_v20 = vld [vmem:[%s2085_s4 + $0x10] sm:$0xff] (!%p322_p3)  ;;  %v439_v58 = vsub.s32 (!%p322_p3), 1, %v414_v55  ;;  %v467_v63 = vsub.s32 (!%p322_p3), 2, %v414_v55  ;;  %p1409_p9 = scmp.ne.s32.totalorder (!%p322_p3), %s1608_s30, 0 }
  0x10   : > { %1556 = vset.pattern.permute.xlu0 (!%p322_p3), %v1636_v4  ;;  %426 = vperm.xlu1 (!%p322_p3), %1551, %v390_v3   ;;  %v718_v19 = vld [vmem:[%s2087_s6 + $0x28] sm:$0xff] (!%p322_p3)  ;;  %v1562_v21 = vld [vmem:[%s2084_s3] sm:$0xff] (!%p322_p3)   ;;  %v720_v22 = vld [vmem:[%s2087_s6 + $0x38] sm:$0xff] (!%p322_p3) }
  0x11   : > { %450 = vperm.xlu0 (!%p322_p3), %1556, %v389_v0   ;;  %v551_v23 = vld [vmem:[%s2085_s4 + $0x20] sm:$0xff] (!%p322_p3)  ;;  %1443 = vmatprep.mubr.msk.bf16.mxu1 (!%p322_p3), %vm615_vm0, %v1562_v21  ;;  %v888_v24 = vld [vmem:[%s2089_s8 + $0x8] sm:$0xff] (!%p322_p3)  ;;  %v553_v25 = vld [vmem:[%s2085_s4 + $0x30] sm:$0xff] (!%p322_p3) }
  0x12   : > { %s2110_s11 = smov (!%p368_p6, %s1616_s11), 1  ;;  %v890_v26 = vld [vmem:[%s2089_s8 + $0x18] sm:$0xff]  ;;  %v713_v27 = vld [vmem:[%s2087_s6] sm:$0xff]  ;;  %v892_v28 = vld [vmem:[%s2089_s8 + $0x28] sm:$0xff]  ;;  %s2112_s20 = smov (!%p370_p8, %s367_s20), 3 }
  0x13   : > { %s1375_s23 = sshll.u32 %s2110_s11, 5  ;;  %v715_v29 = vld [vmem:[%s2087_s6 + $0x10] sm:$0xff]  ;;  %v894_v30 = vld [vmem:[%s2089_s8 + $0x38] sm:$0xff]  ;;  %v717_v31 = vld [vmem:[%s2087_s6 + $0x20] sm:$0xff]  ;;  %s1372_s22 = sshll.u32 %s2110_s11, 2  ;;  %vm1196_vm2 = vcmask (!%p1409_p9), 7168  }
  0x14   : > { %s381_s24 = scalar_select %p380_p7, %s1612_s10, 1  ;;  %1552 = vset.pattern.permute.xlu1 %v1636_v4  ;;  %v896_v32 = vld [vmem:[%s2089_s8 + $0x48] sm:$0xff]  ;;  %v719_v33 = vld [vmem:[%s2087_s6 + $0x30] sm:$0xff]  ;;  %v898_v34 = vld [vmem:[%s2089_s8 + $0x58] sm:$0xff] }
  0x15   : > { %462 = vperm.xlu0 %1556, %v392_v5   ;;  %454 = vperm.xlu1 %1552, %v390_v3   ;;  %v887_v35 = vld [vmem:[%s2089_s8] sm:$0xff]  ;;  %v900_v36 = vld [vmem:[%s2089_s8 + $0x68] sm:$0xff]  ;;  %v889_v37 = vld [vmem:[%s2089_s8 + $0x10] sm:$0xff] }
  0x16   : > { %s1374_s27 = sshll.u32 %s381_s24, 4  ;;  %v902_v38 = vld [vmem:[%s2089_s8 + $0x78] sm:$0xff]  ;;  %v891_v39 = vld [vmem:[%s2089_s8 + $0x20] sm:$0xff]  ;;  %v893_v40 = vld [vmem:[%s2089_s8 + $0x30] sm:$0xff] }
  0x17   : > { %s384_s28 = sadd.s32 %s1375_s23, %s1374_s27  ;;  %v895_v41 = vld [vmem:[%s2089_s8 + $0x40] sm:$0xff]  ;;  %v897_v42 = vld [vmem:[%s2089_s8 + $0x50] sm:$0xff]  ;;  %s373_s23 = sadd.s32 %s1372_s22, %s2112_s20  ;;  %v1565_v52 = vld [vmem:[%s2084_s3 + $0x18] sm:$0xff]  }
  0x18   : > { %s1376_s29 = sshll.u32 %s384_s28, 3  ;;  %v899_v43 = vld [vmem:[%s2089_s8 + $0x60] sm:$0xff]  ;;  %v901_v44 = vld [vmem:[%s2089_s8 + $0x70] sm:$0xff]  ;;  %s1373_s24 = sshll.u32 %s373_s23, 2 }
  0x19   : > { %s1755_s21 = scalar_lea.vmem %s2090_s9, %s1376_s29  ;;  %1559 = vset.pattern.permute.xlu0 %v1637_v7  ;;  %1553 = vset.pattern.permute.xlu1 %v1637_v7  ;;  %s375_s10 = scalar_lea.vmem %s2081_s0, %s1373_s24 }
  0x1a   : > { %395 = vperm.xlu0 %1559, %v389_v0   ;;  %405 = vperm.xlu1 %1553, %v391_v6   ;;  %v388_v59 = vld [vmem:[%s375_s10] sm:$0xf] }
  0x1b   : > { %v416_v61 = vrot.slane %v388_v59, %v415_v57  ;;  %v440_v0 = vrot.slane %v388_v59, %v439_v58 }
  0x1e   : > { %400 = vperm.xlu0 %1559, %v390_v3   ;;  %1554 = vset.pattern.permute.xlu1 %v1635_v2 }
  0x1f   : > { %430 = vperm.xlu1 %1554, %v391_v6  }
  0x22   : > { %410 = vperm.xlu0 %1559, %v392_v5  }
  0x23   : > { %434 = vperm.xlu1 %1554, %v392_v5  }
  0x26   : > { %511 = vperm.xlu0 %1559, %v505_v8  }
  0x27   : > { %1557 = vset.pattern.permute.xlu1 %v1634_v1 }
  0x28   : > { %482 = vperm.xlu1 %1557, %v390_v3   ;;  %v468_v3 = vrot.slane %v388_v59, %v467_v63 }
  0x2a   : > { %526 = vperm.xlu0 %1559, %v508_v9  }
  0x2c   : > { %1558 = vset.pattern.permute.xlu1 %v1636_v4 }
  0x2d   : > { %458 = vperm.xlu1 %1558, %v391_v6  }
  0x2e   : > { %562 = vperm.xlu0 %1559, %v548_v10  }
  0x31   : > { %1560 = vset.pattern.permute.xlu1 %v1634_v1  ;;  %v495_v1 = vsub.s32 3, %v414_v55 }
  0x32   : > { %572 = vperm.xlu0 %1559, %v550_v11   ;;  %486 = vperm.xlu1 %1560, %v391_v6  }
  0x36   : > { %582 = vperm.xlu0 %1559, %v552_v12   ;;  %490 = vperm.xlu1 %1560, %v392_v5  }
  0x3a   : > { %592 = vperm.xlu0 %1559, %v554_v13   ;;  %1561 = vset.pattern.permute.xlu1 %v1637_v7  ;;  %v496_v7 = vrot.slane %v388_v59, %v495_v1 }
  0x3b   : > { %516 = vperm.xlu1 %1561, %v506_v14  }
  0x3e   : > { %728 = vperm.xlu0 %1559, %v714_v15  }
  0x3f   : > { %521 = vperm.xlu1 %1561, %v507_v16  }
  0x42   : > { %738 = vperm.xlu0 %1559, %v716_v17  }
  0x43   : > { %557 = vperm.xlu1 %1561, %v547_v18  }
  0x46   : > { %748 = vperm.xlu0 %1559, %v718_v19  }
  0x47   : > { %567 = vperm.xlu1 %1561, %v549_v20  }
  0x4a   : > { %758 = vperm.xlu0 %1559, %v720_v22  }
  0x4b   : > { %577 = vperm.xlu1 %1561, %v551_v23  }
  0x4e   : > { %910 = vperm.xlu0 %1559, %v888_v24  }
  0x4f   : > { %587 = vperm.xlu1 %1561, %v553_v25  }
  0x52   : > { %920 = vperm.xlu0 %1559, %v890_v26  }
  0x53   : > { %723 = vperm.xlu1 %1561, %v713_v27  }
  0x56   : > { %930 = vperm.xlu0 %1559, %v892_v28  }
  0x57   : > { %733 = vperm.xlu1 %1561, %v715_v29  }
  0x5a   : > { %940 = vperm.xlu0 %1559, %v894_v30  }
  0x5b   : > { %743 = vperm.xlu1 %1561, %v717_v31  }
  0x5e   : > { %950 = vperm.xlu0 %1559, %v896_v32  }
  0x5f   : > { %753 = vperm.xlu1 %1561, %v719_v33  }
  0x62   : > { %960 = vperm.xlu0 %1559, %v898_v34  }
  0x63   : > { %905 = vperm.xlu1 %1561, %v887_v35  }
  0x66   : > { %970 = vperm.xlu0 %1559, %v900_v36  }
  0x67   : > { %915 = vperm.xlu1 %1561, %v889_v37  }
  0x6a   : > { %980 = vperm.xlu0 %1559, %v902_v38  }
  0x6b   : > { %925 = vperm.xlu1 %1561, %v891_v39  }
  0x6f   : > { %935 = vperm.xlu1 %1561, %v893_v40  }
  0x73   : > { %945 = vperm.xlu1 %1561, %v895_v41  }
  0x77   : > { %955 = vperm.xlu1 %1561, %v897_v42  }
  0x7b   : > { %965 = vperm.xlu1 %1561, %v899_v43  }
  0x7f   : > { %975 = vperm.xlu1 %1561, %v901_v44  }
  0x8b   : > { %v423_v45 = vpop.permute.xlu1 %422  ;;  %v479_v46 = vpop.permute.xlu0 %478 }
  0x8c   : > { %v441_v6 = vmul.f32 %v440_v0, %v423_v45  ;;  %v497_v15 = vmul.f32 %v496_v7, %v479_v46 }
  0x8f   : > { %v427_v47 = vpop.permute.xlu1 %426 }
  0x90   : > { %v451_v48 = vpop.permute.xlu0 %450  ;;  %v442_v13 = vmul.f32 %v440_v0, %v427_v47 }
  0x91   : > { %v469_v8 = vmul.f32 %v468_v3, %v451_v48 }
  0x94   : > { %v455_v49 = vpop.permute.xlu1 %454  ;;  %v463_v51 = vpop.permute.xlu0 %462 }
  0x95   : > { %v472_v16 = vmul.f32 %v468_v3, %v463_v51  ;;  %v470_v21 = vmul.f32 %v468_v3, %v455_v49  ;;  %v1564_v51 = vld [vmem:[%s2084_s3 + $0x10] sm:$0xff]  }
  0x99   : > { %v406_v50 = vpop.permute.xlu1 %405  ;;  %v396_v54 = vpop.permute.xlu0 %395 }
  0x9a   : > { %v417_v2 = vmul.f32 %v416_v61, %v396_v54  ;;  %v419_v24 = vmul.f32 %v416_v61, %v406_v50  ;;  %v1563_v50 = vld [vmem:[%s2084_s3 + $0x8] sm:$0xff]  }
  0x9c   : > { %v445_v9 = vadd.f32 %v441_v6, %v417_v2 }
  0x9d   : > { %v401_v60 = vpop.permute.xlu0 %400 }
  0x9e   : > { %v431_v53 = vpop.permute.xlu1 %430  ;;  %v418_v10 = vmul.f32 %v416_v61, %v401_v60  ;;  %v473_v19 = vadd.f32 %v469_v8, %v445_v9 }
  0x9f   : > { %v443_v20 = vmul.f32 %v440_v0, %v431_v53  ;;  %v1566_v53 = vld [vmem:[%s2086_s5] sm:$0xff]  }
  0xa0   : > { %v446_v17 = vadd.f32 %v442_v13, %v418_v10  ;;  %v501_v27 = vadd.f32 %v497_v15, %v473_v19 }
  0xa1   : > { %v411_v4 = vpop.permute.xlu0 %410  ;;  %v447_v31 = vadd.f32 %v443_v20, %v419_v24 }
  0xa2   : > { %v435_v56 = vpop.permute.xlu1 %434  ;;  %v420_v11 = vmul.f32 %v416_v61, %v411_v4  ;;  %v474_v30 = vadd.f32 %v470_v21, %v446_v17 }
  0xa3   : > { %v444_v12 = vmul.f32 %v440_v0, %v435_v56 }
  0xa5   : > { %v448_v18 = vadd.f32 %v444_v12, %v420_v11  ;;  %v512_v25 = vpop.permute.xlu0 %511 }
  0xa6   : > { %v529_v32 = vadd.f32 %v512_v25, %v501_v27  ;;  %v1568_v27 = vld [vmem:[%s2086_s5 + $0x10] sm:$0xff]  }
  0xa7   : > { %v483_v62 = vpop.permute.xlu1 %482  ;;  %v476_v29 = vadd.f32 %v472_v16, %v448_v18 }
  0xa8   : > { %v498_v22 = vmul.f32 %v496_v7, %v483_v62  ;;  %v533_v40 = vmax.f32 %v529_v32, 0.0 }
  0xa9   : > { %v527_v39 = vpop.permute.xlu0 %526 }
  0xaa   : > { %v502_v35 = vadd.f32 %v498_v22, %v474_v30 }
  0xac   : > { %v459_v5 = vpop.permute.xlu1 %458 }
  0xad   : > { %v471_v28 = vmul.f32 %v468_v3, %v459_v5  ;;  %v563_v55 = vpop.permute.xlu0 %562 }
  0xaf   : > { %v475_v37 = vadd.f32 %v471_v28, %v447_v31  ;;  %v1569_v28 = vld [vmem:[%s2086_s5 + $0x18] sm:$0xff]  }
  0xb1   : > { %v487_v14 = vpop.permute.xlu1 %486  ;;  %v573_v57 = vpop.permute.xlu0 %572 }
  0xb2   : > { %v499_v33 = vmul.f32 %v496_v7, %v487_v14 }
  0xb4   : > { %v503_v43 = vadd.f32 %v499_v33, %v475_v37 }
  0xb5   : > { %v491_v23 = vpop.permute.xlu1 %490  ;;  %v583_v2 = vpop.permute.xlu0 %582 }
  0xb6   : > { %v500_v26 = vmul.f32 %v496_v7, %v491_v23 }
  0xb8   : > { %v504_v34 = vadd.f32 %v500_v26, %v476_v29  ;;  %v1567_v26 = vld [vmem:[%s2086_s5 + $0x8] sm:$0xff]   ;;  %v1570_v29 = vld [vmem:[%s2088_s7] sm:$0xff]  }
  0xb9   : > { %v593_v14 = vpop.permute.xlu0 %592  ;;  %1475 = vmatprep.mubr.msk.bf16.mxu0 %vm781_vm1, %v1570_v29 }
  0xba   : > { %v517_v36 = vpop.permute.xlu1 %516  ;;  %v532_v41 = vadd.f32 %v527_v39, %v504_v34 }
  0xbb   : > { %v530_v38 = vadd.f32 %v517_v36, %v502_v35 }
  0xbc   : > { %v536_v48 = vmax.f32 %v532_v41, 0.0 }
  0xbd   : > { %v534_v42 = vmax.f32 %v530_v38, 0.0  ;;  %v729_v31 = vpop.permute.xlu0 %728 }
  0xbe   : > { %v522_v44 = vpop.permute.xlu1 %521 }
  0xbf   : > { %v531_v45 = vadd.f32 %v522_v44, %v503_v43  ;;  %v545_v46 = vpack.c.bf16 %v534_v42, %v533_v40 }
  0xc1   : > { %v535_v47 = vmax.f32 %v531_v45, 0.0  ;;  %1439 = vmatprep.subr.bf16.mxu1 %v545_v46  ;;  %v739_v33 = vpop.permute.xlu0 %738 }
  0xc2   : > { %1440 = vmatpush3.bf16.msra.mxu1 %v545_v46  ;;  %v558_v54 = vpop.permute.xlu1 %557 }
  0xc3   : > { %v546_v49 = vpack.c.bf16 %v536_v48, %v535_v47 }
  0xc5   : > { %1441 = vmatprep.subr.bf16.mxu1 %v546_v49  ;;  %v749_v42 = vpop.permute.xlu0 %748 }
  0xc6   : > { %1442 = vmatpush3.bf16.msra.mxu1 %v546_v49  ;;  %v568_v56 = vpop.permute.xlu1 %567 }
  0xc9   : > { %1444 = vmatmul.mubr.msk.bf16.vlgmr.msra.gmra.mrb[0].mxu1 %vm615_vm0, %v1563_v50 }
  0xca   : > { %1447 = vmatprep.mubr.msk.bf16.mxu1 %vm615_vm0, %v1564_v51  ;;  %v578_v61 = vpop.permute.xlu1 %577 }
  0xce   : > { %v588_v9 = vpop.permute.xlu1 %587 }
  0xd1   : > { %1448 = vmatmul.mubr.msk.bf16.gmra.mrb[4].mxu1 %vm615_vm0, %v1565_v52 }
  0xd2   : > { %1459 = vmatprep.mubr.msk.bf16.mxu1 %vm781_vm1, %v1566_v53  ;;  %v724_v30 = vpop.permute.xlu1 %723 }
  0xd6   : > { %v734_v32 = vpop.permute.xlu1 %733 }
  0xda   : > { %v744_v37 = vpop.permute.xlu1 %743 }
  0xde   : > { %v754_v49 = vpop.permute.xlu1 %753 }
 0x19c   : > { %v1445_v58 = vpop.f32.mrb[0].mxu1 }
 0x19d   : > { %v671_v59 = vadd.f32 %v1445_v58, %v568_v56  ;;  %v662_v60 = vpop.f32.mrb[1].mxu1 }
 0x19e   : > { %v663_v62 = vadd.f32 %v662_v60, %v558_v54  ;;  %v1446_v63 = vpop.f32.mrb[2].mxu1  ;;  %v759_v54 = vpop.permute.xlu0 %758 }
 0x19f   : > { %v674_v0 = vadd.f32 %v1446_v63, %v573_v57  ;;  %v665_v1 = vpop.f32.mrb[3].mxu1  ;;  %v695_v4 = vmax.f32 %v671_v59, 0.0 }
 0x1a0   : > { %v666_v3 = vadd.f32 %v665_v1, %v563_v55  ;;  %v693_v6 = vmax.f32 %v663_v62, 0.0 }
 0x1a1   : > { %v696_v5 = vmax.f32 %v674_v0, 0.0 }
 0x1a2   : > { %v694_v7 = vmax.f32 %v666_v3, 0.0  ;;  %v1572_v3 = vld [vmem:[%s2088_s7 + $0x10] sm:$0xff]  }
 0x1a3   : > { %v710_v8 = vpack.c.bf16 %v696_v5, %v695_v4  ;;  %v1573_v4 = vld [vmem:[%s2088_s7 + $0x18] sm:$0xff]   ;;  %v1574_v5 = vld [vmem:[%s2088_s7 + $0x20] sm:$0xff]  }
 0x1a4   : > { %v709_v10 = vpack.c.bf16 %v694_v7, %v693_v6  ;;  %v1449_v11 = vpop.f32.mrb[4].mxu1  ;;  %v1575_v6 = vld [vmem:[%s2088_s7 + $0x28] sm:$0xff]   ;;  %v1576_v7 = vld [vmem:[%s2088_s7 + $0x30] sm:$0xff]  }
 0x1a5   : > { %v687_v12 = vadd.f32 %v1449_v11, %v588_v9  ;;  %v678_v13 = vpop.f32.mrb[5].mxu1  ;;  %v906_v9 = vpop.permute.xlu1 %905 }
 0x1a6   : > { %v679_v15 = vadd.f32 %v678_v13, %v578_v61  ;;  %v1450_v16 = vpop.f32.mrb[6].mxu1  ;;  %1451 = vmatprep.subr.bf16.mxu1 %v709_v10 }
 0x1a7   : > { %v690_v17 = vadd.f32 %v1450_v16, %v593_v14  ;;  %v681_v18 = vpop.f32.mrb[7].mxu1  ;;  %1452 = vmatpush3.bf16.msra.mxu1 %v709_v10  ;;  %v699_v20 = vmax.f32 %v687_v12, 0.0  ;;  %v911_v10 = vpop.permute.xlu0 %910 }
 0x1a8   : > { %v682_v19 = vadd.f32 %v681_v18, %v583_v2  ;;  %1453 = vmatprep.subr.bf16.mxu1 %v710_v8  ;;  %v697_v22 = vmax.f32 %v679_v15, 0.0  ;;  %v1571_v2 = vld [vmem:[%s2088_s7 + $0x8] sm:$0xff]  }
 0x1a9   : > { %v700_v21 = vmax.f32 %v690_v17, 0.0  ;;  %v916_v11 = vpop.permute.xlu1 %915 }
 0x1aa   : > { %v698_v23 = vmax.f32 %v682_v19, 0.0 }
 0x1ab   : > { %v712_v24 = vpack.c.bf16 %v700_v21, %v699_v20  ;;  %1454 = vmatpush3.bf16.msra.mxu1 %v710_v8  ;;  %v1577_v8 = vld [vmem:[%s2088_s7 + $0x38] sm:$0xff]   ;;  %v921_v12 = vpop.permute.xlu0 %920 }
 0x1ac   : > { %v711_v25 = vpack.c.bf16 %v698_v23, %v697_v22 }
 0x1ad   : > { %v926_v13 = vpop.permute.xlu1 %925 }
 0x1ae   : > { %1455 = vmatprep.subr.bf16.mxu1 %v711_v25 }
 0x1af   : > { %1456 = vmatpush3.bf16.msra.mxu1 %v711_v25  ;;  %v931_v14 = vpop.permute.xlu0 %930 }
 0x1b0   : > { %1457 = vmatprep.subr.bf16.mxu1 %v712_v24 }
 0x1b1   : > { %v936_v20 = vpop.permute.xlu1 %935 }
 0x1b3   : > { %1458 = vmatpush3.bf16.msra.mxu1 %v712_v24 }
 0x1b6   : > { %1460 = vmatmul.mubr.msk.bf16.vlgmr.msra.gmra.mrb[8].mxu1 %vm781_vm1, %v1567_v26  ;;  %v941_v26 = vpop.permute.xlu0 %940 }
 0x1b7   : > { %1463 = vmatprep.mubr.msk.bf16.mxu1 %vm781_vm1, %v1568_v27 }
 0x1be   : > { %1464 = vmatmul.mubr.msk.bf16.gmra.mrb[12].mxu1 %vm781_vm1, %v1569_v28 }
 0x289   : > { %v1461_v34 = vpop.f32.mrb[8].mxu1 }
 0x28a   : > { %v837_v35 = vadd.f32 %v1461_v34, %v734_v32  ;;  %v828_v36 = vpop.f32.mrb[9].mxu1  ;;  %v951_v34 = vpop.permute.xlu0 %950 }
 0x28b   : > { %v829_v38 = vadd.f32 %v828_v36, %v724_v30  ;;  %v1462_v39 = vpop.f32.mrb[10].mxu1  ;;  %v946_v30 = vpop.permute.xlu1 %945 }
 0x28c   : > { %v840_v40 = vadd.f32 %v1462_v39, %v739_v33  ;;  %v831_v41 = vpop.f32.mrb[11].mxu1  ;;  %v861_v44 = vmax.f32 %v837_v35, 0.0 }
 0x28d   : > { %v832_v43 = vadd.f32 %v831_v41, %v729_v31  ;;  %v859_v46 = vmax.f32 %v829_v38, 0.0 }
 0x28e   : > { %v862_v45 = vmax.f32 %v840_v40, 0.0 }
 0x28f   : > { %v860_v47 = vmax.f32 %v832_v43, 0.0  ;;  %v956_v41 = vpop.permute.xlu1 %955 }
 0x290   : > { %v884_v48 = vpack.c.bf16 %v862_v45, %v861_v44  ;;  %v961_v44 = vpop.permute.xlu0 %960 }
 0x291   : > { %v1465_v50 = vpop.f32.mrb[12].mxu1  ;;  %v883_v51 = vpack.c.bf16 %v860_v47, %v859_v46 }
 0x292   : > { %v853_v52 = vadd.f32 %v1465_v50, %v754_v49  ;;  %v844_v53 = vpop.f32.mrb[13].mxu1 }
 0x293   : > { %v845_v55 = vadd.f32 %v844_v53, %v744_v37  ;;  %v1466_v56 = vpop.f32.mrb[14].mxu1  ;;  %1467 = vmatprep.subr.bf16.mxu0 %v883_v51  ;;  %v966_v53 = vpop.permute.xlu1 %965 }
 0x294   : > { %v856_v57 = vadd.f32 %v1466_v56, %v759_v54  ;;  %v847_v58 = vpop.f32.mrb[15].mxu1  ;;  %1468 = vmatpush3.bf16.msra.mxu0 %v883_v51  ;;  %v865_v60 = vmax.f32 %v853_v52, 0.0  ;;  %v971_v56 = vpop.permute.xlu0 %970 }
 0x295   : > { %v848_v59 = vadd.f32 %v847_v58, %v749_v42  ;;  %1469 = vmatprep.subr.bf16.mxu0 %v884_v48  ;;  %v863_v62 = vmax.f32 %v845_v55, 0.0 }
 0x296   : > { %v866_v61 = vmax.f32 %v856_v57, 0.0 }
 0x297   : > { %v864_v63 = vmax.f32 %v848_v59, 0.0 }
 0x298   : > { %v886_v0 = vpack.c.bf16 %v866_v61, %v865_v60  ;;  %1470 = vmatpush3.bf16.msra.mxu0 %v884_v48 }
 0x299   : > { %v885_v1 = vpack.c.bf16 %v864_v63, %v863_v62  ;;  %v976_v63 = vpop.permute.xlu1 %975 }
 0x29b   : > { %1471 = vmatprep.subr.bf16.mxu0 %v885_v1 }
 0x29c   : > { %1472 = vmatpush3.bf16.msra.mxu0 %v885_v1 }
 0x29d   : > { %1473 = vmatprep.subr.bf16.mxu0 %v886_v0 }
 0x2a0   : > { %1474 = vmatpush3.bf16.msra.mxu0 %v886_v0 }
 0x2a3   : > { %1476 = vmatmul.mubr.msk.bf16.vlgmr.msra.gmra.mrb[0].mxu0 %vm781_vm1, %v1571_v2 }
 0x2a4   : > { %1479 = vmatprep.mubr.msk.bf16.mxu0 %vm781_vm1, %v1572_v3 }
 0x2ab   : > { %1480 = vmatmul.mubr.msk.bf16.gmra.mrb[4].mxu0 %vm781_vm1, %v1573_v4  ;;  %v981_v4 = vpop.permute.xlu0 %980 }
 0x2ac   : > { %1483 = vmatprep.mubr.msk.bf16.mxu0 %vm781_vm1, %v1574_v5 }
 0x2b3   : > { %1484 = vmatmul.mubr.msk.bf16.gmra.mrb[8].mxu0 %vm781_vm1, %v1575_v6 }
 0x2b4   : > { %1487 = vmatprep.mubr.msk.bf16.mxu0 %vm781_vm1, %v1576_v7 }
 0x2bb   : > { %1488 = vmatmul.mubr.msk.bf16.gmra.mrb[12].mxu0 %vm781_vm1, %v1577_v8 }
 0x376   : > { %v1477_v15 = vpop.f32.mrb[0].mxu0 }
 0x377   : > { %v1090_v16 = vadd.f32 %v1477_v15, %v916_v11  ;;  %v1081_v17 = vpop.f32.mrb[1].mxu0 }
 0x378   : > { %v1082_v18 = vadd.f32 %v1081_v17, %v906_v9  ;;  %v1478_v19 = vpop.f32.mrb[2].mxu0 }
 0x379   : > { %v1146_v21 = vmax.f32 %v1090_v16, 0.0  ;;  %v1084_v22 = vpop.f32.mrb[3].mxu0  ;;  %v1093_v24 = vadd.f32 %v1478_v19, %v921_v12 }
 0x37a   : > { %v1144_v23 = vmax.f32 %v1082_v18, 0.0  ;;  %v1085_v25 = vadd.f32 %v1084_v22, %v911_v10 }
 0x37b   : > { %1164 = vmax.xlane.f32.xlu0 %v1146_v21  ;;  %v1147_v28 = vmax.f32 %v1093_v24, 0.0 }
 0x37c   : > { %v1145_v27 = vmax.f32 %v1085_v25, 0.0  ;;  %1160 = vmax.xlane.f32.xlu1 %v1144_v23 }
 0x37e   : > { %v1481_v29 = vpop.f32.mrb[4].mxu0 }
 0x37f   : > { %v1106_v31 = vadd.f32 %v1481_v29, %v936_v20  ;;  %v1097_v32 = vpop.f32.mrb[5].mxu0  ;;  %1162 = vmax.xlane.f32.xlu0 %v1145_v27 }
 0x380   : > { %v1482_v33 = vpop.f32.mrb[6].mxu0  ;;  %1166 = vmax.xlane.f32.xlu1 %v1147_v28  ;;  %v1098_v36 = vadd.f32 %v1097_v32, %v926_v13 }
 0x381   : > { %v1150_v35 = vmax.f32 %v1106_v31, 0.0  ;;  %v1109_v37 = vadd.f32 %v1482_v33, %v941_v26  ;;  %v1100_v38 = vpop.f32.mrb[7].mxu0 }
 0x382   : > { %v1101_v40 = vadd.f32 %v1100_v38, %v931_v14  ;;  %v1148_v42 = vmax.f32 %v1098_v36, 0.0 }
 0x383   : > { %v1151_v39 = vmax.f32 %v1109_v37, 0.0  ;;  %1172 = vmax.xlane.f32.xlu0 %v1150_v35 }
 0x384   : > { %v1149_v45 = vmax.f32 %v1101_v40, 0.0 }
 0x385   : > { %1174 = vmax.xlane.f32.xlu1 %v1151_v39 }
 0x386   : > { %v1485_v43 = vpop.f32.mrb[8].mxu0 }
 0x387   : > { %v1122_v46 = vadd.f32 %v1485_v43, %v956_v41  ;;  %v1113_v47 = vpop.f32.mrb[9].mxu0  ;;  %1168 = vmax.xlane.f32.xlu0 %v1148_v42 }
 0x388   : > { %v1486_v48 = vpop.f32.mrb[10].mxu0  ;;  %v1114_v50 = vadd.f32 %v1113_v47, %v946_v30 }
 0x389   : > { %v1154_v49 = vmax.f32 %v1122_v46, 0.0  ;;  %v1125_v51 = vadd.f32 %v1486_v48, %v961_v44  ;;  %v1116_v52 = vpop.f32.mrb[11].mxu0  ;;  %1170 = vmax.xlane.f32.xlu1 %v1149_v45 }
 0x38a   : > { %v1117_v55 = vadd.f32 %v1116_v52, %v951_v34  ;;  %v1152_v57 = vmax.f32 %v1114_v50, 0.0 }
 0x38b   : > { %v1155_v54 = vmax.f32 %v1125_v51, 0.0  ;;  %1180 = vmax.xlane.f32.xlu0 %v1154_v49 }
 0x38c   : > { %v1153_v59 = vmax.f32 %v1117_v55, 0.0 }
 0x38d   : > { %1182 = vmax.xlane.f32.xlu1 %v1155_v54 }
 0x38e   : > { %v1489_v58 = vpop.f32.mrb[12].mxu0 }
 0x38f   : > { %v1129_v60 = vpop.f32.mrb[13].mxu0  ;;  %1176 = vmax.xlane.f32.xlu0 %v1152_v57  ;;  %v1138_v1 = vadd.f32 %v1489_v58, %v976_v63 }
 0x390   : > { %v1130_v61 = vadd.f32 %v1129_v60, %v966_v53  ;;  %v1490_v62 = vpop.f32.mrb[14].mxu0 }
 0x391   : > { %v1132_v0 = vpop.f32.mrb[15].mxu0  ;;  %1178 = vmax.xlane.f32.xlu1 %v1153_v59  ;;  %v1141_v5 = vadd.f32 %v1490_v62, %v981_v4  ;;  %v1158_v7 = vmax.f32 %v1138_v1, 0.0 }
 0x392   : > { %v1156_v2 = vmax.f32 %v1130_v61, 0.0  ;;  %v1133_v3 = vadd.f32 %v1132_v0, %v971_v56 }
 0x393   : > { %v1159_v8 = vmax.f32 %v1141_v5, 0.0 }
 0x394   : > { %v1157_v6 = vmax.f32 %v1133_v3, 0.0  ;;  %1184 = vmax.xlane.f32.xlu0 %v1156_v2 }
 0x396   : > { %1186 = vmax.xlane.f32.xlu1 %v1157_v6 }
 0x398   : > { %1188 = vmax.xlane.f32.xlu0 %v1158_v7 }
 0x39a   : > { %1190 = vmax.xlane.f32.xlu1 %v1159_v8 }
 0x408   : > { %v1165_v9 = vpop.xlane.xlu0 %1164 }
 0x409   : > { %v1161_v10 = vpop.xlane.xlu1 %1160  ;;  %1199 = vst.msk [vmem:[%s1755_s21 + $0x10] sm:$0xff] (!%p1409_p9), %vm1196_vm2, %v1165_v9 }
 0x40a   : > { %1197 = vst.msk [vmem:[%s1755_s21] sm:$0xff] (!%p1409_p9), %vm1196_vm2, %v1161_v10 }
 0x40c   : > { %v1163_v11 = vpop.xlane.xlu0 %1162 }
 0x40d   : > { %v1167_v12 = vpop.xlane.xlu1 %1166  ;;  %1198 = vst.msk [vmem:[%s1755_s21 + $0x8] sm:$0xff] (!%p1409_p9), %vm1196_vm2, %v1163_v11 }
 0x40e   : > { %1200 = vst.msk [vmem:[%s1755_s21 + $0x18] sm:$0xff] (!%p1409_p9), %vm1196_vm2, %v1167_v12 }
 0x410   : > { %v1938_v13 = vpop.xlane.xlu0 %1172 }
 0x411   : > { %1203 = vst.msk [vmem:[%s1755_s21 + $0x30] sm:$0xff] (!%p1409_p9), %vm1196_vm2, %v1938_v13 }
 0x412   : > { %v1940_v14 = vpop.xlane.xlu1 %1174 }
 0x413   : > { %1204 = vst.msk [vmem:[%s1755_s21 + $0x38] sm:$0xff] (!%p1409_p9), %vm1196_vm2, %v1940_v14 }
 0x414   : > { %v1169_v15 = vpop.xlane.xlu0 %1168 }
 0x415   : > { %1201 = vst.msk [vmem:[%s1755_s21 + $0x20] sm:$0xff] (!%p1409_p9), %vm1196_vm2, %v1169_v15 }
 0x416   : > { %v1171_v16 = vpop.xlane.xlu1 %1170 }
 0x417   : > { %1202 = vst.msk [vmem:[%s1755_s21 + $0x28] sm:$0xff] (!%p1409_p9), %vm1196_vm2, %v1171_v16 }
 0x418   : > { %v1942_v17 = vpop.xlane.xlu0 %1180 }
 0x419   : > { %1207 = vst.msk [vmem:[%s1755_s21 + $0x50] sm:$0xff] (!%p1409_p9), %vm1196_vm2, %v1942_v17 }
 0x41a   : > { %v1944_v18 = vpop.xlane.xlu1 %1182 }
 0x41b   : > { %1208 = vst.msk [vmem:[%s1755_s21 + $0x58] sm:$0xff] (!%p1409_p9), %vm1196_vm2, %v1944_v18 }
 0x41c   : > { %v1946_v19 = vpop.xlane.xlu0 %1176 }
 0x41d   : > { %1205 = vst.msk [vmem:[%s1755_s21 + $0x40] sm:$0xff] (!%p1409_p9), %vm1196_vm2, %v1946_v19 }
 0x41e   : > { %v1948_v20 = vpop.xlane.xlu1 %1178 }
 0x41f   : > { %1206 = vst.msk [vmem:[%s1755_s21 + $0x48] sm:$0xff] (!%p1409_p9), %vm1196_vm2, %v1948_v20 }
 0x421   : > { %v1950_v21 = vpop.xlane.xlu0 %1184  ;;  %1195 = sbr.rel (%p1409_p9) target bundleno = 1065 (0x429), region = 60 }
 0x422   : > { %1209 = vst.msk [vmem:[%s1755_s21 + $0x60] sm:$0xff] (!%p1409_p9), %vm1196_vm2, %v1950_v21 }
 0x423   : > { %v1952_v22 = vpop.xlane.xlu1 %1186 }
 0x424   : > { %1210 = vst.msk [vmem:[%s1755_s21 + $0x68] sm:$0xff] (!%p1409_p9), %vm1196_vm2, %v1952_v22 }
 0x425   : > { %v1954_v23 = vpop.xlane.xlu0 %1188 }
 0x426   : > { %1211 = vst.msk [vmem:[%s1755_s21 + $0x70] sm:$0xff] (!%p1409_p9), %vm1196_vm2, %v1954_v23 }
 0x427   : > { %v1956_v24 = vpop.xlane.xlu1 %1190 }
 0x428   : > { %1212 = vst.msk [vmem:[%s1755_s21 + $0x78] sm:$0xff] %vm1196_vm2, %v1956_v24 }
 0x429 PF: > { %p1410_p10 = scmp.le.s32.totalorder %s1608_s30, 0 }
 0x42a   : > { %v1217_v25 = vld [vmem:[%s1755_s21] sm:$0xff] (!%p1410_p10)  ;;  %vm1249_vm3 = vcmask (!%p1410_p10), 7168   ;;  %v1218_v26 = vld [vmem:[%s1755_s21 + $0x8] sm:$0xff] (!%p1410_p10)  ;;  %v1219_v27 = vld [vmem:[%s1755_s21 + $0x10] sm:$0xff] (!%p1410_p10) }
 0x42b   : > { %1216 = sbr.rel (%p1410_p10) target bundleno = 1077 (0x435), region = 64  ;;  %v1233_v28 = vmax.f32 (!%p1410_p10), %v1217_v25, %v1161_v10  ;;  %v1234_v29 = vmax.f32 (!%p1410_p10), %v1218_v26, %v1163_v11  ;;  %v1235_v30 = vmax.f32 (!%p1410_p10), %v1219_v27, %v1165_v9  ;;  %v1220_v31 = vld [vmem:[%s1755_s21 + $0x18] sm:$0xff] (!%p1410_p10)  ;;  %v1221_v32 = vld [vmem:[%s1755_s21 + $0x20] sm:$0xff] (!%p1410_p10)  ;;  %v1222_v33 = vld [vmem:[%s1755_s21 + $0x28] sm:$0xff] (!%p1410_p10) }
 0x42c   : > { %v1236_v34 = vmax.f32 (!%p1410_p10), %v1220_v31, %v1167_v12  ;;  %v1237_v35 = vmax.f32 (!%p1410_p10), %v1221_v32, %v1169_v15  ;;  %v1238_v36 = vmax.f32 (!%p1410_p10), %v1222_v33, %v1171_v16  ;;  %v1223_v37 = vld [vmem:[%s1755_s21 + $0x30] sm:$0xff] (!%p1410_p10)  ;;  %v1224_v38 = vld [vmem:[%s1755_s21 + $0x38] sm:$0xff] (!%p1410_p10)  ;;  %v1225_v39 = vld [vmem:[%s1755_s21 + $0x40] sm:$0xff] (!%p1410_p10) }
 0x42d   : > { %1250 = vst.msk [vmem:[%s1755_s21] sm:$0xff] (!%p1410_p10), %vm1249_vm3, %v1233_v28  ;;  %1251 = vst.msk [vmem:[%s1755_s21 + $0x8] sm:$0xff] (!%p1410_p10), %vm1249_vm3, %v1234_v29  ;;  %v1239_v40 = vmax.f32 (!%p1410_p10), %v1223_v37, %v1938_v13  ;;  %v1240_v41 = vmax.f32 (!%p1410_p10), %v1224_v38, %v1940_v14  ;;  %v1241_v42 = vmax.f32 (!%p1410_p10), %v1225_v39, %v1946_v19  ;;  %v1226_v43 = vld [vmem:[%s1755_s21 + $0x48] sm:$0xff] (!%p1410_p10)  ;;  %v1227_v44 = vld [vmem:[%s1755_s21 + $0x50] sm:$0xff] (!%p1410_p10) }
 0x42e   : > { %1252 = vst.msk [vmem:[%s1755_s21 + $0x10] sm:$0xff] (!%p1410_p10), %vm1249_vm3, %v1235_v30  ;;  %v1228_v45 = vld [vmem:[%s1755_s21 + $0x58] sm:$0xff] (!%p1410_p10)  ;;  %1253 = vst.msk [vmem:[%s1755_s21 + $0x18] sm:$0xff] (!%p1410_p10), %vm1249_vm3, %v1236_v34  ;;  %v1242_v46 = vmax.f32 (!%p1410_p10), %v1226_v43, %v1948_v20  ;;  %v1243_v47 = vmax.f32 (!%p1410_p10), %v1227_v44, %v1942_v17  ;;  %v1229_v49 = vld [vmem:[%s1755_s21 + $0x60] sm:$0xff] (!%p1410_p10) }
 0x42f   : > { %1254 = vst.msk [vmem:[%s1755_s21 + $0x20] sm:$0xff] (!%p1410_p10), %vm1249_vm3, %v1237_v35  ;;  %1255 = vst.msk [vmem:[%s1755_s21 + $0x28] sm:$0xff] (!%p1410_p10), %vm1249_vm3, %v1238_v36  ;;  %v1244_v48 = vmax.f32 (!%p1410_p10), %v1228_v45, %v1944_v18  ;;  %v1230_v50 = vld [vmem:[%s1755_s21 + $0x68] sm:$0xff] (!%p1410_p10)  ;;  %v1231_v51 = vld [vmem:[%s1755_s21 + $0x70] sm:$0xff] (!%p1410_p10)  ;;  %v1245_v52 = vmax.f32 (!%p1410_p10), %v1229_v49, %v1950_v21 }
 0x430   : > { %1256 = vst.msk [vmem:[%s1755_s21 + $0x30] sm:$0xff] (!%p1410_p10), %vm1249_vm3, %v1239_v40  ;;  %1257 = vst.msk [vmem:[%s1755_s21 + $0x38] sm:$0xff] (!%p1410_p10), %vm1249_vm3, %v1240_v41  ;;  %v1246_v53 = vmax.f32 (!%p1410_p10), %v1230_v50, %v1952_v22  ;;  %v1247_v54 = vmax.f32 (!%p1410_p10), %v1231_v51, %v1954_v23  ;;  %v1232_v55 = vld [vmem:[%s1755_s21 + $0x78] sm:$0xff] (!%p1410_p10) }
 0x431   : > { %1258 = vst.msk [vmem:[%s1755_s21 + $0x40] sm:$0xff] (!%p1410_p10), %vm1249_vm3, %v1241_v42  ;;  %1259 = vst.msk [vmem:[%s1755_s21 + $0x48] sm:$0xff] (!%p1410_p10), %vm1249_vm3, %v1242_v46  ;;  %v1248_v56 = vmax.f32 (!%p1410_p10), %v1232_v55, %v1956_v24 }
 0x432   : > { %1260 = vst.msk [vmem:[%s1755_s21 + $0x50] sm:$0xff] %vm1249_vm3, %v1243_v47  ;;  %1261 = vst.msk [vmem:[%s1755_s21 + $0x58] sm:$0xff] %vm1249_vm3, %v1244_v48 }
 0x433   : > { %1262 = vst.msk [vmem:[%s1755_s21 + $0x60] sm:$0xff] %vm1249_vm3, %v1245_v52  ;;  %1263 = vst.msk [vmem:[%s1755_s21 + $0x68] sm:$0xff] %vm1249_vm3, %v1246_v53 }
 0x434   : > { %1264 = vst.msk [vmem:[%s1755_s21 + $0x70] sm:$0xff] %vm1249_vm3, %v1247_v54  ;;  %1265 = vst.msk [vmem:[%s1755_s21 + $0x78] sm:$0xff] %vm1249_vm3, %v1248_v56 }
 0x435 PF: > { %s19_s15 = sadd.s32 1, %s1632_s15   ;;  %s2092_s29 = sld [smem:[#allocation2_spill]] }
 0x436   : > { %p16_p11 = scmp.ge.s32.totalorder %s19_s15, 10   ;;  %s2093_s30 = smov %s1620_s12 }
 0x437   : > { %s2094_s10 = smov %s1624_s13  ;;  %s2095_s11 = smov %s1628_s14 }
 0x438   : > { %s2096_s12 = smov %s2100_s16  ;;  %s2097_s13 = smov %s2104_s17 }
 0x439   :  { %18 = sbr.rel (!%p16_p11) target bundleno = 4 (0x4), region = 94 }
 0x43b   : > { %s2098_s14 = smov %s2092_s29 }

</bundles_post_ra>
